<compile_context>
chip_gen: v7x
topology: tpu7x:2x2x1
jax: 0.10.0
libtpu: 0.0.40
codegen_flags: <defaults>
</compile_context>

<pallas_src>
import jax
import jax.numpy as jnp
from jax.experimental import pallas as pl
from jax.experimental.pallas import tpu as pltpu

_MiB = 1024 * 1024

# Preferred lane widths (multiples of 128); 512 first so medium tensors still
# get several rows to tile over.
_LANE_CANDIDATES = (512, 1024, 2048, 4096, 256, 128)


def _arelu_kernel(alpha_ref, beta_ref, x_ref, o_ref):
    # alpha_ref / beta_ref hold the already-finished f32 scalars:
    #   alpha = clamp(alpha_param, 0.01, 0.99), beta = 1 + sigmoid(beta_param)
    x = x_ref[...]
    alpha = alpha_ref[0].astype(x.dtype)   # scalar cast once; vector path stays x.dtype
    beta = beta_ref[0].astype(x.dtype)
    scale = jnp.where(x > 0, beta, alpha)           # compare + select
    o_ref[...] = (x * scale).astype(o_ref.dtype)    # single mul (+ no-op cast)


def _vmem_budget():
    """Generation-aware (vmem_limit_bytes, max_tile_bytes)."""
    cap = 64 * _MiB  # conservative default: v7x per-TC VMEM
    try:
        cap = int(getattr(pltpu.get_tpu_info(), "vmem_capacity_bytes", cap))
    except Exception:
        pass
    vmem_limit = min(cap * 3 // 4, 100 * _MiB)   # 48 MiB on v7x, 96 MiB on v5e/v6e
    max_tile = (vmem_limit - 8 * _MiB) // 4      # double-buffered in+out + headroom
    return int(vmem_limit), int(max_tile)


def _choose_tm(m, row_bytes, sub, target_tile_bytes):
    """Pick the row-tile size: sublane-aligned, large, and an even step count."""
    if m <= 2 * sub:
        return m  # single full-extent block (tiny tensor)
    # Rows per tile from the byte budget, aligned down to the sublane tile.
    tm = (target_tile_bytes // row_bytes) // sub * sub
    tm = max(sub, min(tm, m))
    nsteps = pl.cdiv(m, tm)
    # Force an even number of near-equal steps (>=2) so both v7x TCs get
    # balanced work; near-neutral on single-TC v5e/v6e.
    if nsteps < 2:
        nsteps = 2
    if nsteps % 2 == 1:
        nsteps += 1
    tm = pl.cdiv(pl.cdiv(m, nsteps), sub) * sub
    if tm >= m:
        return m
    return tm


def _arelu_2d(x2d, alpha_c, beta_c, target_tile_bytes, vmem_limit):
    m, lw = x2d.shape
    bytes_per_el = jnp.dtype(x2d.dtype).itemsize
    sub = max(8, 32 // bytes_per_el)  # 8 for f32, 16 for bf16, 32 for int8/fp8
    tm = _choose_tm(m, lw * bytes_per_el, sub, target_tile_bytes)
    grid = (pl.cdiv(m, tm),)

    return pl.pallas_call(
        _arelu_kernel,
        out_shape=jax.ShapeDtypeStruct((m, lw), x2d.dtype),
        grid=grid,
        in_specs=[
            pl.BlockSpec(memory_space=pltpu.MemorySpace.SMEM),  # alpha (finished, f32)
            pl.BlockSpec(memory_space=pltpu.MemorySpace.SMEM),  # beta  (finished, f32)
            pl.BlockSpec((tm, lw), lambda i: (i, 0)),           # x tile
        ],
        out_specs=pl.BlockSpec((tm, lw), lambda i: (i, 0)),
        compiler_params=pltpu.CompilerParams(
            dimension_semantics=("parallel",),
            vmem_limit_bytes=vmem_limit,
        ),
    )(alpha_c, beta_c, x2d)


def arelu(x, alpha, beta, *, target_tile_bytes=None):
    """AReLU forward. x: any float array (e.g. NCHW). alpha/beta: shape-(1,) params."""
    orig_shape = x.shape
    dtype = x.dtype
    total = x.size

    # Precompute the two scalars once, in the wrapper (plain JAX), as float32.
    alpha_c = jnp.clip(jnp.asarray(alpha, dtype=jnp.float32).reshape(1), 0.01, 0.99)
    beta_c = 1.0 + jax.nn.sigmoid(jnp.asarray(beta, dtype=jnp.float32).reshape(1))

    vmem_limit, max_tile = _vmem_budget()
    if target_tile_bytes is None:
        target_tile_bytes = 16 * _MiB
    target_tile_bytes = max(1 * _MiB, min(int(target_tile_bytes), max_tile))

    # Lane-dense 2D layout (common case: element count divisible by 128).
    lw = None
    for cand in _LANE_CANDIDATES:
        if total % cand == 0:
            lw = cand
            break

    if lw is not None:
        x2d = x.reshape(-1, lw)
        out2d = _arelu_2d(x2d, alpha_c, beta_c, target_tile_bytes, vmem_limit)
        return out2d.reshape(orig_shape)

    # Fallback (element count not a multiple of 128): kernel on the 128-aligned
    # bulk, <=127-element tail in plain XLA.  No full-tensor pad/slice passes.
    x_flat = x.reshape(-1)
    bulk_n = (total // 128) * 128
    parts = []
    if bulk_n:
        bulk2d = x_flat[:bulk_n].reshape(-1, 128)
        parts.append(
            _arelu_2d(bulk2d, alpha_c, beta_c, target_tile_bytes, vmem_limit).reshape(-1)
        )
    tail = x_flat[bulk_n:]
    if tail.size:
        a_t = alpha_c[0].astype(dtype)
        b_t = beta_c[0].astype(dtype)
        parts.append(tail * jnp.where(tail > 0, b_t, a_t))
    out_flat = parts[0] if len(parts) == 1 else jnp.concatenate(parts)
    return out_flat.reshape(orig_shape)


def arelu_ref(x, alpha, beta):
    a = jnp.clip(alpha.astype(jnp.float32), 0.01, 0.99)
    b = 1.0 + jax.nn.sigmoid(beta.astype(jnp.float32))
    out = jnp.maximum(x, 0.0) * b - jnp.maximum(-x, 0.0) * a
    return out.astype(x.dtype)


if __name__ == "__main__":
    key = jax.random.PRNGKey(0)
    # NCHW input consistent with conv-style usage of the activation
    x = jax.random.normal(key, (2, 4, 16, 16), dtype=jnp.float32)

    # deterministic parameter init matching AReLU.__init__(alpha=0.9, beta=2.0)
    alpha = jnp.array([0.9], dtype=jnp.float32)
    beta = jnp.array([2.0], dtype=jnp.float32)

    out = arelu(x, alpha, beta)
    jax.block_until_ready(out)

    ref = arelu_ref(x, alpha, beta)
    assert out.shape == x.shape and out.dtype == x.dtype
    assert jnp.allclose(out, ref, atol=1e-6, rtol=1e-6), "mismatch vs reference"

    print("KERNEL_OK")
</pallas_src>

<mosaic_0001>
module attributes {stable_mosaic.version = 11 : i64} {
  func.func @_arelu_kernel(%arg0: i32, %arg1: memref<1xf32, #tpu.memory_space<smem>>, %arg2: memref<1xf32, #tpu.memory_space<smem>>, %arg3: memref<4x512xf32, #tpu.memory_space<vmem>>, %arg4: memref<4x512xf32, #tpu.memory_space<vmem>>) attributes {dimension_semantics = [#tpu.dimension_semantics<parallel>], iteration_bounds = array<i64: 1>, scalar_prefetch = 0 : i64, scratch_operands = 0 : i64, tpu.core_type = #tpu.core_type<tc>, window_params = [{transform_indices = @transform_0, window_bounds = array<i64: 1>}, {transform_indices = @transform_1, window_bounds = array<i64: 1>}, {transform_indices = @transform_2, window_bounds = array<i64: 4, 512>}, {transform_indices = @transform_3, window_bounds = array<i64: 4, 512>}]} {
    %c0 = arith.constant 0 : index
    %c0_0 = arith.constant 0 : index
    %0 = vector.load %arg3[%c0, %c0_0] : memref<4x512xf32, #tpu.memory_space<vmem>>, vector<4x512xf32>
    %c0_1 = arith.constant 0 : index
    %1 = memref.load %arg1[%c0_1] : memref<1xf32, #tpu.memory_space<smem>>
    %c0_2 = arith.constant 0 : index
    %2 = memref.load %arg2[%c0_2] : memref<1xf32, #tpu.memory_space<smem>>
    %cst = arith.constant 0.000000e+00 : f32
    %3 = vector.broadcast %cst : f32 to vector<4x512xf32>
    %4 = arith.cmpf ogt, %0, %3 : vector<4x512xf32>
    %5 = vector.broadcast %2 : f32 to vector<4x512xf32>
    %6 = vector.broadcast %1 : f32 to vector<4x512xf32>
    %7 = arith.select %4, %5, %6 : vector<4x512xi1>, vector<4x512xf32>
    %8 = arith.mulf %0, %7 : vector<4x512xf32>
    %c0_3 = arith.constant 0 : index
    %c0_4 = arith.constant 0 : index
    %9 = vector.load %arg4[%c0_3, %c0_4] : memref<4x512xf32, #tpu.memory_space<vmem>>, vector<4x512xf32>
    tpu.vector_store %arg4[%c0_3, %c0_4], %8 {strides = array<i32>} : memref<4x512xf32, #tpu.memory_space<vmem>>, vector<4x512xf32>,
    return
  }
  func.func @transform_0(%arg0: i32) -> i32 {
    %c0_i32 = arith.constant 0 : i32
    %c0_i32_0 = arith.constant 0 : i32
    return %c0_i32 : i32
  }
  func.func @transform_1(%arg0: i32) -> i32 {
    %c0_i32 = arith.constant 0 : i32
    %c0_i32_0 = arith.constant 0 : i32
    return %c0_i32 : i32
  }
  func.func @transform_2(%arg0: i32) -> (i32, i32) {
    %c0_i32 = arith.constant 0 : i32
    %c0_i32_0 = arith.constant 0 : i32
    return %arg0, %c0_i32 : i32, i32
  }
  func.func @transform_3(%arg0: i32) -> (i32, i32) {
    %c0_i32 = arith.constant 0 : i32
    %c0_i32_0 = arith.constant 0 : i32
    return %arg0, %c0_i32 : i32, i32
  }
}

</mosaic_0001>

<bundles_post_ra>
// kernel: tpu_custom_call.1
= control target key start
LH: loop header
LB: loop body
LE: loop exit
PB: predicated region body
PF: predicated region fallthrough
CT: control target
= control target key end

     0   :  { %10 = vsyncpa [#allocation5], 0  ;;  %s160_s0 = inlined_call_operand.<no memory space> [shape: f32[1], index: 0, kind: input, shape index: {}]   ;;  %s161_s1 = inlined_call_operand.<no memory space> [shape: f32[1], index: 1, kind: input, shape index: {}]   ;;  %s162_s2 = inlined_call_operand.hbm [shape: f32[4,512], index: 2, kind: input, shape index: {}]   ;;  %s163_s3 = inlined_call_operand.hbm [shape: f32[4,512], index: 3, kind: output, shape index: {}]  }
   0x1   :  { %11 = vsyncpa [#allocation6], 0  ;;  %s108_s12 = smov [#allocation4]   ;;  %s60_s16 = scalar_lea.hbm %s162_s2, 256 }
   0x2   :  { %s22_s13 = sshll.u32 %s108_s12, 4  ;;  %p61_p0 = scmp.ne.s32.totalorder %s162_s2, %s60_s16  ;;  %s23_s13 = int_to_ptr.vmem [resolvable:$true] %s22_s13 }
   0x3   :  { %p64_p1 = scmp.lt.u32.totalorder %s60_s16, %s162_s2 }
   0x5   :  { %p66_p2 = pnand %p64_p1, %p61_p0 }
   0x7   :  { %69 = shalt.err (!%p66_p2)
}
   0x8   :  { %s70_s21 = scalar_lea.vmem %s23_s13, 256  ;;  %p75_p4 = scmp.lt.s32.totalorder %s23_s13, %s23_s13 }
   0x9   :  { %p71_p3 = scmp.ne.s32.totalorder %s23_s13, %s70_s21  ;;  %p76_p5 = scmp.lt.s32.totalorder %s70_s21, %s70_s21 }
   0xb   :  { %p77_p6 = por %p76_p5, %p75_p4 }
   0xd   :  { %p78_p7 = pnand %p77_p6, %p71_p3 }
   0xf   :  { %81 = shalt.err (!%p78_p7)
}
  0x10   :  { %25 = dma.hbm_to_vmem [thread:$0]  %s162_s2, 256, %s23_s13, [#allocation5]  }
  0x11   :  { %104 = dma.done.wait [#allocation5], 256  }
  0x12   :  { %105 = vsyncadd [#allocation5], 4294967040  ;;  %v35_v0 = vstv %s161_s1  ;;  %v36_v1 = vstv %s160_s0  ;;  %v29_v2 = vld [vmem:[#allocation4] sm:$0xff]  ;;  %v30_v3 = vld [vmem:[#allocation4 + $0x8] sm:$0xff]  ;;  %s109_s28 = smov [#allocation7]  }
  0x13   :  { %s49_s29 = sshll.u32 %s109_s28, 4  ;;  %vm33_vm0 = vcmp.gt.f32.partialorder %v29_v2, 0.0  ;;  %vm34_vm1 = vcmp.gt.f32.partialorder %v30_v3, 0.0  ;;  %s50_s29 = int_to_ptr.vmem [resolvable:$true] %s49_s29 }
  0x14   :  { %v37_v4 = vsel %vm33_vm0, %v35_v0, %v36_v1  ;;  %v38_v5 = vsel %vm34_vm1, %v35_v0, %v36_v1  ;;  %s82_s2 = scalar_lea.vmem %s50_s29, 256  ;;  %p87_p9 = scmp.lt.s32.totalorder %s50_s29, %s50_s29 }
  0x15   :  { %v39_v6 = vmul.f32 %v37_v4, %v29_v2  ;;  %v40_v7 = vmul.f32 %v38_v5, %v30_v3  ;;  %p83_p8 = scmp.ne.s32.totalorder %s50_s29, %s82_s2  ;;  %p88_p10 = scmp.lt.s32.totalorder %s82_s2, %s82_s2 }
  0x17   :  { %41 = vst [vmem:[#allocation7] sm:$0xff] %v39_v6  ;;  %42 = vst [vmem:[#allocation7 + $0x8] sm:$0xff] %v40_v7  ;;  %p89_p11 = por %p88_p10, %p87_p9 }
  0x19   :  { %p90_p12 = pnand %p89_p11, %p83_p8 }
  0x1b   :  { %93 = shalt.err (!%p90_p12)
}
  0x1c   :  { %s94_s30 = scalar_lea.hbm %s163_s3, 256 }
  0x1d   :  { %p95_p13 = scmp.ne.s32.totalorder %s163_s3, %s94_s30  ;;  %p98_p0 = scmp.lt.u32.totalorder %s94_s30, %s163_s3 }
  0x1f   :  { %p100_p1 = pnand %p98_p0, %p95_p13 }
  0x21   :  { %103 = shalt.err (!%p100_p1)
}
  0x22   :  { %52 = dma.vmem_to_hbm [thread:$0]  %s50_s29, 256, %s163_s3, [#allocation6]  }
  0x23   :  { %106 = dma.done.wait [#allocation6], 256  }
  0x24   :  { %107 = vsyncadd [#allocation6], 4294967040 }
  0x25   :  { %56 = vsyncpa [#allocation5], 1 }
  0x26   :  { %57 = vsyncpa [#allocation6], 1 }

</bundles_post_ra>
